<compile_context>
chip_gen: v7x
topology: tpu7x:2x2x1
jax: 0.10.0
libtpu: 0.0.40
codegen_flags: <defaults>
</compile_context>

<pallas_src>
import functools
import math

import jax
import jax.numpy as jnp
from jax import lax
from jax.experimental import pallas as pl
from jax.experimental.pallas import tpu as pltpu

LN_EPS = 1e-12  # BERT LayerNorm eps


@functools.lru_cache(maxsize=None)
def _chip_defaults():
    """Generation-aware (vmem_limit_bytes, preferred query tile)."""
    try:
        kind = jax.devices()[0].device_kind.lower()
    except Exception:
        kind = ""
    if "7" in kind:                        # v7x: 64 MiB VMEM/TC (leave headroom), 256-wide MXU
        return 52 * 2**20, 256
    if "v6" in kind or "6e" in kind:       # v6e: 128 MiB VMEM, 256-wide MXU
        return 100 * 2**20, 256
    if "v5" in kind:                       # v5e/v5p: 128 MiB VMEM, 128-wide MXU
        return 96 * 2**20, 128
    return 64 * 2**20, 128                 # unknown / older: conservative


def _const_spec(shape):
    """BlockSpec for a grid-invariant operand: constant index, single-buffered."""
    zeros = (0,) * len(shape)
    return pl.BlockSpec(shape, lambda *_: zeros,
                        pipeline_mode=pl.Buffered(buffer_count=1))


def _layernorm(x, gamma, beta):
    mu = jnp.mean(x, axis=-1, keepdims=True)
    xc = x - mu
    var = jnp.mean(xc * xc, axis=-1, keepdims=True)
    return xc * lax.rsqrt(var + LN_EPS) * gamma + beta


def _gelu(x):
    # exact (erf-based) GELU, as used by HF BERT's "gelu"
    return 0.5 * x * (1.0 + lax.erf(x * 0.7071067811865476))


# ---------------------------------------------------------------------------
# Kernel 1: embedding sum + LayerNorm (one batch element per grid step)
#   word-embedding gather happens in JAX glue; pos/type embeddings are passed
#   un-broadcast ((S,H) / (1,H)) and broadcast-added inside the kernel.
# ---------------------------------------------------------------------------
def embed_ln_kernel(we_ref, pe_ref, te_ref, g_ref, b_ref, out_ref):
    x = we_ref[0].astype(jnp.float32) + pe_ref[...] + te_ref[...]   # (S,H)+(S,H)+(1,H)
    out_ref[0] = _layernorm(x, g_ref[...], b_ref[...]).astype(out_ref.dtype)


# ---------------------------------------------------------------------------
# Kernel 2: one full BERT encoder layer (self-attention + FFN)
#   grid = (batch "parallel", query-tile "arbitrary").  The full (S,H) sequence
#   is DMA'd once per batch element; K/V are projected once per batch element
#   into a persistent VMEM scratch and reused by every query tile.
# ---------------------------------------------------------------------------
def encoder_layer_kernel(xf_ref, mask_ref,
                         wqkv_ref, bqkv_ref, wo_ref, bo_ref,
                         ln1g_ref, ln1b_ref,
                         w1_ref, b1_ref, w2_ref, b2_ref,
                         ln2g_ref, ln2b_ref,
                         out_ref, kv_ref, *, num_heads, q_tile):
    S, H = xf_ref.shape[1], xf_ref.shape[2]
    TQ = q_tile
    d = H // num_heads
    qi = pl.program_id(1)

    # K/V projection for the full sequence: computed once per batch element
    # (qi == 0, qi axis is "arbitrary") and reused for all query tiles.
    @pl.when(qi == 0)
    def _():
        xf_b = xf_ref[0].astype(jnp.bfloat16)                            # (S, H)
        kv = jnp.dot(xf_b, wqkv_ref[:, H:],
                     preferred_element_type=jnp.float32) + bqkv_ref[:, H:]  # (S, 2H)
        kv_ref[...] = kv.astype(jnp.bfloat16)

    # query tile sliced from the full-sequence block (no duplicate input DMA)
    start = pl.multiple_of(qi * TQ, TQ)
    xq_b = xf_ref[0, pl.ds(start, TQ), :].astype(jnp.bfloat16)           # (TQ, H)
    xq = xq_b.astype(jnp.float32)                                        # residual path

    # Q projection (attention scale already folded into wqkv/bqkv host-side)
    q = jnp.dot(xq_b, wqkv_ref[:, :H],
                preferred_element_type=jnp.float32) + bqkv_ref[:, :H]    # (TQ, H)

    kv = kv_ref[...]
    qh = q.reshape(TQ, num_heads, d).astype(jnp.bfloat16)
    kh = kv[:, :H].reshape(S, num_heads, d)
    vh = kv[:, H:].reshape(S, num_heads, d)

    # batched attention over all heads at once
    # TODO(synk): verify with pl.lower_as_mlir that these einsums don't emit extra
    # cross-lane relayouts; if they do, restructure with a leading head axis.
    s = jnp.einsum("qhd,khd->hqk", qh, kh,
                   preferred_element_type=jnp.float32)                   # (nh, TQ, S)
    s = s + mask_ref[...]                                                # (1,1,S) additive bias
    s = s - jnp.max(s, axis=-1, keepdims=True)
    p = jnp.exp(s)
    p = p * pl.reciprocal(jnp.sum(p, axis=-1, keepdims=True), approx=True)

    ctx = jnp.einsum("hqk,khd->qhd", p.astype(jnp.bfloat16), vh,
                     preferred_element_type=jnp.float32)                 # (TQ, nh, d)
    ctx = ctx.reshape(TQ, H)

    attn = jnp.dot(ctx.astype(jnp.bfloat16), wo_ref[...],
                   preferred_element_type=jnp.float32) + bo_ref[...]
    x1 = _layernorm(attn + xq, ln1g_ref[...], ln1b_ref[...])

    h1 = _gelu(jnp.dot(x1.astype(jnp.bfloat16), w1_ref[...],
                       preferred_element_type=jnp.float32) + b1_ref[...])
    h2 = jnp.dot(h1.astype(jnp.bfloat16), w2_ref[...],
                 preferred_element_type=jnp.float32) + b2_ref[...]
    out_ref[0] = _layernorm(h2 + x1, ln2g_ref[...], ln2b_ref[...]).astype(out_ref.dtype)


# ---------------------------------------------------------------------------
# Wrappers
# ---------------------------------------------------------------------------
def embeddings_forward(eparams, input_ids, out_dtype=jnp.bfloat16):
    B, S = input_ids.shape
    H = eparams["word_emb"].shape[-1]
    vmem_limit, _ = _chip_defaults()

    # TODO(synk): fuse the word-embedding gather into the kernel (scalar-prefetched
    # input_ids + manual row DMA from the HBM table) to drop this (B,S,H) round trip.
    we = jnp.take(eparams["word_emb"], input_ids, axis=0)       # (B,S,H)
    pe = eparams["pos_emb"][:S]                                 # (S,H)
    te = eparams["type_emb"][0:1]                               # (1,H) token_type_ids == 0

    act = pl.BlockSpec((1, S, H), lambda b: (b, 0, 0))
    return pl.pallas_call(
        embed_ln_kernel,
        out_shape=jax.ShapeDtypeStruct((B, S, H), out_dtype),
        grid=(B,),
        in_specs=[act,
                  _const_spec((S, H)),
                  _const_spec((1, H)),
                  _const_spec((1, H)),
                  _const_spec((1, H))],
        out_specs=act,
        compiler_params=pltpu.CompilerParams(
            dimension_semantics=("parallel",),
            vmem_limit_bytes=vmem_limit),
    )(we, pe, te, eparams["ln_g"], eparams["ln_b"])


def encoder_layer_forward(x, ext_mask, lp, num_heads, q_tile=None,
                          out_dtype=jnp.bfloat16):
    B, S, H = x.shape
    assert H % num_heads == 0
    vmem_limit, tq_default = _chip_defaults()

    TQ = q_tile if q_tile is not None else min(S, tq_default)
    if S % TQ != 0 or TQ % 8 != 0:
        TQ = S                                   # fallback: one query tile
    nq = S // TQ

    params = [lp["wqkv"], lp["bqkv"], lp["wo"], lp["bo"],
              lp["ln1_g"], lp["ln1_b"],
              lp["w1"], lp["b1"], lp["w2"], lp["b2"],
              lp["ln2_g"], lp["ln2_b"]]

    in_specs = [
        pl.BlockSpec((1, S, H), lambda b, qi: (b, 0, 0)),   # full x (DMA'd once per b)
        pl.BlockSpec((1, 1, S), lambda b, qi: (b, 0, 0)),   # additive mask
    ] + [_const_spec(p.shape) for p in params]              # single-buffered weights

    out_specs = pl.BlockSpec((1, TQ, H), lambda b, qi: (b, qi, 0))

    return pl.pallas_call(
        functools.partial(encoder_layer_kernel, num_heads=num_heads, q_tile=TQ),
        out_shape=jax.ShapeDtypeStruct((B, S, H), out_dtype),
        grid=(B, nq),
        in_specs=in_specs,
        out_specs=out_specs,
        scratch_shapes=[pltpu.VMEM((S, 2 * H), jnp.bfloat16)],   # persistent K/V
        compiler_params=pltpu.CompilerParams(
            dimension_semantics=("parallel", "arbitrary"),
            vmem_limit_bytes=vmem_limit),
    )(x, ext_mask, *params)


def fold_attention_scale(params, num_heads):
    """Host-side, one-time: fold 1/sqrt(head_dim) into the Q columns of wqkv/bqkv."""
    new_layers = []
    for lp in params["layers"]:
        H = lp["wo"].shape[0]
        scale = 1.0 / math.sqrt(H // num_heads)
        wqkv, bqkv = lp["wqkv"], lp["bqkv"]
        wqkv = jnp.concatenate(
            [(wqkv[:, :H].astype(jnp.float32) * scale).astype(wqkv.dtype), wqkv[:, H:]],
            axis=1)
        bqkv = jnp.concatenate([bqkv[:, :H] * scale, bqkv[:, H:]], axis=1)
        nl = dict(lp)
        nl["wqkv"], nl["bqkv"] = wqkv, bqkv
        new_layers.append(nl)
    return dict(emb=params["emb"], layers=new_layers)


def bert_client_forward(params, input_ids, attention_mask, num_heads, q_tile=None):
    B, S = input_ids.shape
    layers = params["layers"]
    n_layers = len(layers)

    emb_dtype = jnp.bfloat16 if n_layers > 0 else jnp.float32
    x = embeddings_forward(params["emb"], input_ids, out_dtype=emb_dtype)

    # _get_extended_attention_mask: (1 - mask) * -10000, broadcast over heads & queries
    ext = (1.0 - attention_mask.astype(jnp.float32)) * -10000.0
    ext = ext.reshape(B, 1, S)

    # TODO(synk): cross-pallas_call weight prefetch (P10) — start the next layer's
    # weight DMA during the current layer's compute — not implemented.
    for i, lp in enumerate(layers):
        out_dtype = jnp.float32 if i == n_layers - 1 else jnp.bfloat16
        x = encoder_layer_forward(x, ext, lp, num_heads, q_tile=q_tile,
                                  out_dtype=out_dtype)
    return x


# ---------------------------------------------------------------------------
# Pure-JAX f32 reference (module semantics) for a correctness check
# ---------------------------------------------------------------------------
def reference_forward(params, input_ids, attention_mask, num_heads):
    B, S = input_ids.shape
    ep = params["emb"]
    H = ep["word_emb"].shape[-1]
    x = (jnp.take(ep["word_emb"], input_ids, axis=0)
         + ep["pos_emb"][:S][None]
         + ep["type_emb"][0][None, None])
    x = _layernorm(x, ep["ln_g"][0], ep["ln_b"][0])
    ext = ((1.0 - attention_mask.astype(jnp.float32)) * -10000.0)[:, None, None, :]
    d = H // num_heads
    for lp in params["layers"]:
        wqkv = lp["wqkv"].astype(jnp.float32)
        wo = lp["wo"].astype(jnp.float32)
        w1 = lp["w1"].astype(jnp.float32)
        w2 = lp["w2"].astype(jnp.float32)
        qkv = x @ wqkv + lp["bqkv"][0]
        q, k, v = qkv[..., :H], qkv[..., H:2 * H], qkv[..., 2 * H:]
        q = q.reshape(B, S, num_heads, d).transpose(0, 2, 1, 3)
        k = k.reshape(B, S, num_heads, d).transpose(0, 2, 1, 3)
        v = v.reshape(B, S, num_heads, d).transpose(0, 2, 1, 3)
        s = jnp.einsum("bhqd,bhkd->bhqk", q, k) / math.sqrt(d) + ext
        p = jax.nn.softmax(s, axis=-1)
        ctx = jnp.einsum("bhqk,bhkd->bhqd", p, v).transpose(0, 2, 1, 3).reshape(B, S, H)
        x1 = _layernorm(ctx @ wo + lp["bo"][0] + x, lp["ln1_g"][0], lp["ln1_b"][0])
        h = _gelu(x1 @ w1 + lp["b1"][0]) @ w2 + lp["b2"][0]
        x = _layernorm(h + x1, lp["ln2_g"][0], lp["ln2_b"][0])
    return x


# ---------------------------------------------------------------------------
# Deterministic parameter init (synthetic, BertConfig-style dims)
#   weight matrices stored bf16 (MXU-native, halves weight DMA bytes);
#   biases / LayerNorm params / embedding tables stay f32.
# ---------------------------------------------------------------------------
def init_params(key, vocab, max_pos, n_types, H, I, n_layers):
    keys = iter(jax.random.split(key, 8 + n_layers * 16))

    def nrm(shape, dtype=jnp.float32):
        return (jax.random.normal(next(keys), shape, jnp.float32) * 0.02).astype(dtype)

    emb = dict(
        word_emb=nrm((vocab, H)),
        pos_emb=nrm((max_pos, H)),
        type_emb=nrm((n_types, H)),
        ln_g=jnp.ones((1, H), jnp.float32),
        ln_b=jnp.zeros((1, H), jnp.float32),
    )
    layers = []
    for _ in range(n_layers):
        wqkv = jnp.concatenate([nrm((H, H)), nrm((H, H)), nrm((H, H))], axis=1)
        bqkv = jnp.concatenate([nrm((1, H)), nrm((1, H)), nrm((1, H))], axis=1)
        layers.append(dict(
            wqkv=wqkv.astype(jnp.bfloat16), bqkv=bqkv,
            wo=nrm((H, H), jnp.bfloat16), bo=nrm((1, H)),
            ln1_g=jnp.ones((1, H), jnp.float32), ln1_b=jnp.zeros((1, H), jnp.float32),
            w1=nrm((H, I), jnp.bfloat16), b1=nrm((1, I)),
            w2=nrm((I, H), jnp.bfloat16), b2=nrm((1, H)),
            ln2_g=jnp.ones((1, H), jnp.float32), ln2_b=jnp.zeros((1, H), jnp.float32),
        ))
    return dict(emb=emb, layers=layers)


if __name__ == "__main__":
    # small BERT-like config (lane-dense H): hidden=128, heads=2, intermediate=512
    B, S, H, NH, I = 2, 16, 128, 2, 512
    TQ = 8                      # query tile -> grid (B, S//TQ) = (2, 2); exercises K/V scratch reuse
    VOCAB, MAX_POS, N_TYPES = 100, 64, 2
    CUT_LAYER = 2

    root = jax.random.PRNGKey(0)
    k_params, k_ids = jax.random.split(root)
    params = init_params(k_params, VOCAB, MAX_POS, N_TYPES, H, I, CUT_LAYER)
    kparams = fold_attention_scale(params, NH)   # kernel uses scale-folded weights

    input_ids = jax.random.randint(k_ids, (B, S), 0, VOCAB, dtype=jnp.int32)
    # ragged attention mask to exercise the -10000 additive masking
    lengths = jnp.array([S, 9], jnp.int32)
    attention_mask = (jnp.arange(S)[None, :] < lengths[:, None]).astype(jnp.int32)

    out = bert_client_forward(kparams, input_ids, attention_mask, NH, q_tile=TQ)
    out = jax.block_until_ready(out)

    ref = reference_forward(params, input_ids, attention_mask, NH)
    assert out.shape == (B, S, H) and out.dtype == jnp.float32
    # bf16 matmuls, bf16 inter-layer activations + approx reciprocal vs pure-f32 reference
    assert jnp.allclose(out, ref, atol=6e-2, rtol=6e-2), "mismatch vs pure-JAX reference"

    print("KERNEL_OK")
</pallas_src>

<mosaic_0001>
module attributes {stable_mosaic.version = 11 : i64} {
  func.func @embed_ln_kernel(%arg0: i32, %arg1: memref<1x16x128xf32, #tpu.memory_space<vmem>>, %arg2: memref<16x128xf32, #tpu.memory_space<vmem>>, %arg3: memref<1x128xf32, #tpu.memory_space<vmem>>, %arg4: memref<1x128xf32, #tpu.memory_space<vmem>>, %arg5: memref<1x128xf32, #tpu.memory_space<vmem>>, %arg6: memref<1x16x128xbf16, #tpu.memory_space<vmem>>) attributes {dimension_semantics = [#tpu.dimension_semantics<parallel>], iteration_bounds = array<i64: 2>, scalar_prefetch = 0 : i64, scratch_operands = 0 : i64, tpu.core_type = #tpu.core_type<tc>, window_params = [{transform_indices = @transform_0, window_bounds = array<i64: 1, 16, 128>}, {pipeline_mode = #tpu.pipeline_mode<synchronous>, transform_indices = @transform_1, window_bounds = array<i64: 16, 128>}, {pipeline_mode = #tpu.pipeline_mode<synchronous>, transform_indices = @transform_2, window_bounds = array<i64: 1, 128>}, {pipeline_mode = #tpu.pipeline_mode<synchronous>, transform_indices = @transform_3, window_bounds = array<i64: 1, 128>}, {pipeline_mode = #tpu.pipeline_mode<synchronous>, transform_indices = @transform_4, window_bounds = array<i64: 1, 128>}, {transform_indices = @transform_5, window_bounds = array<i64: 1, 16, 128>}]} {
    %c0 = arith.constant 0 : index
    %c0_0 = arith.constant 0 : index
    %c0_1 = arith.constant 0 : index
    %0 = vector.load %arg1[%c0, %c0_0, %c0_1] : memref<1x16x128xf32, #tpu.memory_space<vmem>>, vector<1x16x128xf32>
    %1 = vector.shape_cast %0 : vector<1x16x128xf32> to vector<16x128xf32>
    %c0_2 = arith.constant 0 : index
    %c0_3 = arith.constant 0 : index
    %2 = vector.load %arg2[%c0_2, %c0_3] : memref<16x128xf32, #tpu.memory_space<vmem>>, vector<16x128xf32>
    %3 = arith.addf %1, %2 : vector<16x128xf32>
    %c0_4 = arith.constant 0 : index
    %c0_5 = arith.constant 0 : index
    %4 = vector.load %arg3[%c0_4, %c0_5] : memref<1x128xf32, #tpu.memory_space<vmem>>, vector<1x128xf32>
    %5 = vector.broadcast %4 : vector<1x128xf32> to vector<16x128xf32>
    %6 = arith.addf %3, %5 : vector<16x128xf32>
    %c0_6 = arith.constant 0 : index
    %c0_7 = arith.constant 0 : index
    %7 = vector.load %arg4[%c0_6, %c0_7] : memref<1x128xf32, #tpu.memory_space<vmem>>, vector<1x128xf32>
    %c0_8 = arith.constant 0 : index
    %c0_9 = arith.constant 0 : index
    %8 = vector.load %arg5[%c0_8, %c0_9] : memref<1x128xf32, #tpu.memory_space<vmem>>, vector<1x128xf32>
    %cst = arith.constant dense<0.000000e+00> : vector<16xf32>
    %9 = vector.multi_reduction <add>, %6, %cst [1] : vector<16x128xf32> to vector<16xf32>
    %10 = vector.shape_cast %9 : vector<16xf32> to vector<16x1xf32>
    %cst_10 = arith.constant 1.280000e+02 : f32
    %11 = vector.broadcast %cst_10 : f32 to vector<16x1xf32>
    %12 = arith.divf %10, %11 : vector<16x1xf32>
    %13 = vector.broadcast %12 : vector<16x1xf32> to vector<16x128xf32>
    %14 = arith.subf %6, %13 : vector<16x128xf32>
    %15 = arith.mulf %14, %14 : vector<16x128xf32>
    %cst_11 = arith.constant dense<0.000000e+00> : vector<16xf32>
    %16 = vector.multi_reduction <add>, %15, %cst_11 [1] : vector<16x128xf32> to vector<16xf32>
    %17 = vector.shape_cast %16 : vector<16xf32> to vector<16x1xf32>
    %cst_12 = arith.constant 1.280000e+02 : f32
    %18 = vector.broadcast %cst_12 : f32 to vector<16x1xf32>
    %19 = arith.divf %17, %18 : vector<16x1xf32>
    %cst_13 = arith.constant 9.99999996E-13 : f32
    %20 = vector.broadcast %cst_13 : f32 to vector<16x1xf32>
    %21 = arith.addf %19, %20 : vector<16x1xf32>
    %22 = math.rsqrt %21 : vector<16x1xf32>
    %23 = vector.broadcast %22 : vector<16x1xf32> to vector<16x128xf32>
    %24 = arith.mulf %14, %23 : vector<16x128xf32>
    %25 = vector.broadcast %7 : vector<1x128xf32> to vector<16x128xf32>
    %26 = arith.mulf %24, %25 : vector<16x128xf32>
    %27 = vector.broadcast %8 : vector<1x128xf32> to vector<16x128xf32>
    %28 = arith.addf %26, %27 : vector<16x128xf32>
    %29 = arith.truncf %28 : vector<16x128xf32> to vector<16x128xbf16>
    %c0_14 = arith.constant 0 : index
    %c0_15 = arith.constant 0 : index
    %c0_16 = arith.constant 0 : index
    %30 = vector.load %arg6[%c0_14, %c0_15, %c0_16] : memref<1x16x128xbf16, #tpu.memory_space<vmem>>, vector<1x16x128xbf16>
    %31 = vector.shape_cast %30 : vector<1x16x128xbf16> to vector<16x128xbf16>
    %32 = vector.shape_cast %29 : vector<16x128xbf16> to vector<1x16x128xbf16>
    tpu.vector_store %arg6[%c0_14, %c0_15, %c0_16], %32 {strides = array<i32>} : memref<1x16x128xbf16, #tpu.memory_space<vmem>>, vector<1x16x128xbf16>,
    return
  }
  func.func @transform_0(%arg0: i32) -> (i32, i32, i32) {
    %c0_i32 = arith.constant 0 : i32
    %c0_i32_0 = arith.constant 0 : i32
    %c0_i32_1 = arith.constant 0 : i32
    return %arg0, %c0_i32, %c0_i32_0 : i32, i32, i32
  }
  func.func @transform_1(%arg0: i32) -> (i32, i32) {
    %c0_i32 = arith.constant 0 : i32
    %c0_i32_0 = arith.constant 0 : i32
    %c0_i32_1 = arith.constant 0 : i32
    return %c0_i32, %c0_i32_0 : i32, i32
  }
  func.func @transform_2(%arg0: i32) -> (i32, i32) {
    %c0_i32 = arith.constant 0 : i32
    %c0_i32_0 = arith.constant 0 : i32
    %c0_i32_1 = arith.constant 0 : i32
    return %c0_i32, %c0_i32_0 : i32, i32
  }
  func.func @transform_3(%arg0: i32) -> (i32, i32) {
    %c0_i32 = arith.constant 0 : i32
    %c0_i32_0 = arith.constant 0 : i32
    %c0_i32_1 = arith.constant 0 : i32
    return %c0_i32, %c0_i32_0 : i32, i32
  }
  func.func @transform_4(%arg0: i32) -> (i32, i32) {
    %c0_i32 = arith.constant 0 : i32
    %c0_i32_0 = arith.constant 0 : i32
    %c0_i32_1 = arith.constant 0 : i32
    return %c0_i32, %c0_i32_0 : i32, i32
  }
  func.func @transform_5(%arg0: i32) -> (i32, i32, i32) {
    %c0_i32 = arith.constant 0 : i32
    %c0_i32_0 = arith.constant 0 : i32
    %c0_i32_1 = arith.constant 0 : i32
    return %arg0, %c0_i32, %c0_i32_0 : i32, i32, i32
  }
}

</mosaic_0001>

<bundles_post_ra>
// kernel: tpu_custom_call.1
= control target key start
LH: loop header
LB: loop body
LE: loop exit
PB: predicated region body
PF: predicated region fallthrough
CT: control target
= control target key end

     0   :  { %10 = vsyncpa [#allocation3], 0  ;;  %s1160_s0 = inlined_call_operand.hbm [shape: f32[2,16,128], index: 0, kind: input, shape index: {}]   ;;  %s1161_s1 = inlined_call_operand.hbm [shape: f32[16,128], index: 1, kind: input, shape index: {}]   ;;  %s1162_s2 = inlined_call_operand.hbm [shape: f32[1,128], index: 2, kind: input, shape index: {}]   ;;  %s1163_s3 = inlined_call_operand.hbm [shape: f32[1,128], index: 3, kind: input, shape index: {}]   ;;  %s1164_s4 = inlined_call_operand.hbm [shape: f32[1,128], index: 4, kind: input, shape index: {}]   ;;  %s1165_s5 = inlined_call_operand.hbm [shape: bf16[2,16,128], index: 5, kind: output, shape index: {}]  }
   0x1   :  { %12 = vsyncpa [#allocation3 + $0x1], 0 }
   0x2   :  { %13 = vsyncpa [#allocation6], 0 }
   0x3   :  { %14 = vsyncpa [#allocation9], 0 }
   0x4   :  { %15 = vsyncpa [#allocation4], 0 }
   0x5   :  { %17 = vsyncpa [#allocation4 + $0x1], 0  ;;  %s875_s18 = smov 0   ;;  %s877_s19 = smov 0  }
   0x6   :  { %s879_s20 = smov 0   ;;  %s881_s21 = smov 0  }
   0x7 LB: > { %s896_s22 = sadd.s32 4294967295, %s833_s21   ;;  %s486_s23 = sadd.s32 4294967294, %s833_s21   ;;  %s833_s21 = sphi %s881_s21, %s1188_s21   ;;  %s829_s20 = sphi %s879_s20, %s1187_s20   ;;  %s825_s19 = sphi %s877_s19, %s1186_s19   ;;  %s821_s18 = sphi %s875_s18, %s1185_s18  }
   0x8   : > { %p43_p0 = scmp.ne.s32.totalorder %s825_s19, %s821_s18  ;;  %p1166_p1 = scmp.eq.s32.totalorder %s896_s22, 0 }
   0x9   : > { %p157_p3 = scmp.eq.s32.totalorder %s486_s23, 1  ;;  %p487_p5 = scmp.ge.s32.totalorder %s833_s21, 1 }
   0xa   : > { %p905_p4 = por %p1166_p1, %p43_p0  ;;  %p164_p7 = scmp.lt.s32.totalorder %s833_s21, 3 }
   0xb   : > { %p910_p6 = por %p157_p3, %p43_p0  ;;  %s835_s27 = smov [#allocation5]  }
   0xc   : > { %s1169_s24 = scalar_select %p905_p4, 1, 0 }
   0xd   : > { %s1170_s25 = scalar_select %p910_p6, 1, 0 }
   0xe   : > { %p915_p8 = pnand %p487_p5, %p164_p7  ;;  %s176_s28 = sshll.u32 %s835_s27, 4  ;;  %s919_s28 = int_to_ptr.vmem [resolvable:$true] %s176_s28 }
   0xf   : > { %s836_s30 = smov [#allocation8]   ;;  %s837_s7 = smov [#allocation7]  }
  0x10   : > { %s1171_s26 = scalar_select %p915_p8, 1, 0 }
  0x11   : > { %p542_p9 = pneg %p915_p8  ;;  %s201_s6 = sshll.u32 %s836_s30, 4  ;;  %s930_s6 = int_to_ptr.vmem [resolvable:$true] %s201_s6 }
  0x12   : > { %s932_s8 = sshll.u32 %s837_s7, 4  ;;  %s617_s11 = scalar_lea.hbm %s1161_s1, 256  ;;  %s191_s8 = int_to_ptr.vmem [resolvable:$true] %s932_s8 }
  0x13   : > { %p926_p11 = pnand %p542_p9, %p1166_p1  ;;  %p618_p12 = scmp.ne.s32.totalorder %s1161_s1, %s617_s11 }
  0x14   : > { %p624_p5 = scmp.lt.u32.totalorder %s617_s11, %s1161_s1 }
  0x15   : > { %p942_p13 = pneg %p926_p11 }
  0x17   : > { %p620_p0 = pnand %p942_p13, %p618_p12 }
  0x19   : > { %p621_p3 = pneg %p620_p0 }
  0x1b   : > { %p626_p7 = pnand %p624_p5, %p621_p3 }
  0x1d   : > { %629 = shalt.err (!%p626_p7)
}
  0x1e   : > { %s630_s17 = scalar_lea.vmem %s919_s28, 256  ;;  %p638_p2 = scmp.lt.s32.totalorder %s919_s28, %s919_s28 }
  0x1f   : > { %p631_p9 = scmp.ne.s32.totalorder %s919_s28, %s630_s17  ;;  %p639_p6 = scmp.lt.s32.totalorder %s630_s17, %s630_s17 }
  0x21   : > { %p633_p10 = pnand %p631_p9, %p942_p13  ;;  %p640_p12 = por %p639_p6, %p638_p2 }
  0x23   : > { %p634_p1 = pneg %p633_p10 }
  0x25   : > { %p641_p0 = pnand %p640_p12, %p634_p1 }
  0x27   : > { %644 = shalt.err (!%p641_p0)
}
  0x28   : > { %s838_s23 = smov 128   ;;  %s839_s27 = smov 8  }
  0x29   : > { %545 = dma.hbm_to_vmem [thread:$0]  (!%p926_p11), %s1161_s1, 256, %s919_s28, [#allocation6], %s838_s23, %s838_s23, %s839_s27  }
  0x2a   : > { %s645_s11 = scalar_lea.hbm %s1163_s3, 16 }
  0x2b   : > { %p646_p1 = scmp.ne.s32.totalorder %s1163_s3, %s645_s11  ;;  %p652_p10 = scmp.lt.u32.totalorder %s645_s11, %s1163_s3 }
  0x2d   : > { %p648_p2 = pnand %p646_p1, %p942_p13 }
  0x2f   : > { %p649_p6 = pneg %p648_p2 }
  0x31   : > { %p654_p3 = pnand %p652_p10, %p649_p6 }
  0x33   : > { %657 = shalt.err (!%p654_p3)
}
  0x34   : > { %s658_s28 = scalar_lea.vmem %s930_s6, 16  ;;  %s665_s17 = scalar_lea.vmem %s930_s6, 32 }
  0x35   : > { %p659_p5 = scmp.ne.s32.totalorder %s930_s6, %s658_s28  ;;  %p666_p12 = scmp.lt.s32.totalorder %s930_s6, %s930_s6 }
  0x36   : > { %p667_p0 = scmp.lt.s32.totalorder %s665_s17, %s658_s28 }
  0x37   : > { %p661_p7 = pnand %p659_p5, %p942_p13 }
  0x38   : > { %p668_p1 = por %p667_p0, %p666_p12 }
  0x39   : > { %p662_p9 = pneg %p661_p7 }
  0x3b   : > { %p669_p2 = pnand %p668_p1, %p662_p9 }
  0x3d   : > { %672 = shalt.err (!%p669_p2)
}
  0x3e   : > { %551 = dma.hbm_to_vmem [thread:$0]  (!%p926_p11), %s1163_s3, 16, %s930_s6, [#allocation9]  }
  0x3f   : > { %s673_s11 = scalar_lea.hbm %s1162_s2, 16 }
  0x40   : > { %p674_p6 = scmp.ne.s32.totalorder %s1162_s2, %s673_s11  ;;  %p680_p5 = scmp.lt.u32.totalorder %s673_s11, %s1162_s2 }
  0x42   : > { %p676_p10 = pnand %p674_p6, %p942_p13 }
  0x44   : > { %p677_p3 = pneg %p676_p10 }
  0x46   : > { %p682_p7 = pnand %p680_p5, %p677_p3 }
  0x48   : > { %685 = shalt.err (!%p682_p7)
}
  0x49   : > { %s686_s28 = scalar_lea.vmem %s191_s8, 16  ;;  %s693_s6 = scalar_lea.vmem %s191_s8, 32 }
  0x4a   : > { %p687_p9 = scmp.ne.s32.totalorder %s191_s8, %s686_s28  ;;  %p694_p1 = scmp.lt.s32.totalorder %s191_s8, %s191_s8 }
  0x4b   : > { %p695_p2 = scmp.lt.s32.totalorder %s693_s6, %s686_s28 }
  0x4c   : > { %p689_p12 = pnand %p687_p9, %p942_p13 }
  0x4d   : > { %p696_p4 = por %p695_p2, %p694_p1 }
  0x4e   : > { %p690_p0 = pneg %p689_p12 }
  0x50   : > { %p697_p8 = pnand %p696_p4, %p690_p0 }
  0x52   : > { %700 = shalt.err (!%p697_p8)
}
  0x53   : > { %548 = dma.hbm_to_vmem [thread:$0]  (!%p926_p11), %s1162_s2, 16, %s191_s8, [#allocation6]  }
  0x54   : > { %s840_s7 = smov [#allocation10]   ;;  %s701_s12 = scalar_lea.hbm %s1164_s4, 16 }
  0x55   : > { %s212_s9 = sshll.u32 %s840_s7, 4  ;;  %p702_p6 = scmp.ne.s32.totalorder %s1164_s4, %s701_s12  ;;  %s213_s9 = int_to_ptr.vmem [resolvable:$true] %s212_s9 }
  0x56   : > { %p708_p10 = scmp.lt.u32.totalorder %s701_s12, %s1164_s4 }
  0x57   : > { %p704_p4 = pnand %p702_p6, %p942_p13 }
  0x59   : > { %p705_p8 = pneg %p704_p4 }
  0x5b   : > { %p710_p3 = pnand %p708_p10, %p705_p8 }
  0x5d   : > { %713 = shalt.err (!%p710_p3)
}
  0x5e   : > { %s714_s8 = scalar_lea.vmem %s213_s9, 16  ;;  %s721_s6 = scalar_lea.vmem %s213_s9, 32 }
  0x5f   : > { %p715_p5 = scmp.ne.s32.totalorder %s213_s9, %s714_s8  ;;  %p722_p12 = scmp.lt.s32.totalorder %s213_s9, %s213_s9 }
  0x60   : > { %p723_p0 = scmp.lt.s32.totalorder %s721_s6, %s714_s8 }
  0x61   : > { %p717_p7 = pnand %p715_p5, %p942_p13 }
  0x62   : > { %p724_p1 = por %p723_p0, %p722_p12 }
  0x63   : > { %p718_p9 = pneg %p717_p7 }
  0x65   : > { %p725_p2 = pnand %p724_p1, %p718_p9 }
  0x67   : > { %728 = shalt.err (!%p725_p2)
}
  0x68   : > { %554 = dma.hbm_to_vmem [thread:$0]  (!%p926_p11), %s1164_s4, 16, %s213_s9, [#allocation9]  }
  0x69   : > { %s1028_s14 = sadd.s32 1, %s833_s21   ;;  %s30_s7 = sadd.s32 1, %s829_s20 }
  0x6a   : > { %s27_s29 = ssub.s32 %s833_s21, %s1028_s14  ;;  %p37_p13 = scmp.ne.s32.totalorder %s829_s20, %s825_s19 }
  0x6b   : > { %p28_p6 = scmp.eq.s32.totalorder %s27_s29, 0  ;;  %p38_p4 = scmp.eq.s32.totalorder %s833_s21, 0 }
  0x6c   : > { %p1174_p8 = scmp.eq.s32.totalorder %s896_s22, 1  ;;  %p567_p3 = scmp.lt.s32.totalorder %s833_s21, 2 }
  0x6d   : > { %s1044_s11 = scalar_select %p28_p6, %s829_s20, %s30_s7  }
  0x6e   : > { %p1038_p10 = por %p1174_p8, %p37_p13  ;;  %p39_p5 = por %p38_p4, %p37_p13 }
  0x6f   : > { %s223_s12 = sand.u32 1, %s829_s20   ;;  %s513_s9 = sshll.u32 %s833_s21, 8 }
  0x70   : > { %s493_s13 = sshll.u32 %s223_s12, 4  ;;  %s1051_s28 = scalar_lea.hbm %s1160_s0, %s513_s9 }
  0x71   : > { %s227_s8 = scalar_lea.vmem [#allocation2], %s493_s13  ;;  %p1055_p11 = pnand %p567_p3, %p39_p5 }
  0x72   : > { %s234_s6 = sshll.u32 %s227_s8, 4  ;;  %s1059_s30 = scalar_lea.sflag [#allocation3], %s223_s12  ;;  %s1053_s6 = int_to_ptr.vmem [resolvable:$true] %s234_s6 }
  0x73   : > { %s729_s7 = scalar_lea.hbm %s1051_s28, 256  ;;  %p731_p9 = pneg %p1055_p11 }
  0x74   : > { %p730_p7 = scmp.ne.s32.totalorder %s1051_s28, %s729_s7  ;;  %s734_s9 = scalar_lea.hbm %s1160_s0, 512 }
  0x75   : > { %p735_p1 = scmp.lt.u32.totalorder %s1051_s28, %s1160_s0  ;;  %p736_p2 = scmp.lt.u32.totalorder %s734_s9, %s729_s7 }
  0x76   : > { %p732_p12 = pnand %p731_p9, %p730_p7  ;;  %p738_p6 = scmp.lt.u32.totalorder %s729_s7, %s1051_s28 }
  0x77   : > { %p737_p13 = por %p736_p2, %p735_p1 }
  0x78   : > { %p733_p0 = pneg %p732_p12 }
  0x79   : > { %p739_p4 = por %p738_p6, %p737_p13 }
  0x7b   : > { %p740_p8 = pnand %p739_p4, %p733_p0 }
  0x7d   : > { %743 = shalt.err (!%p740_p8)
}
  0x7e   : > { %s744_s12 = scalar_lea.vmem %s1053_s6, 256  ;;  %s841_s8 = smov [#allocation2]  }
  0x7f   : > { %p745_p3 = scmp.ne.s32.totalorder %s1053_s6, %s744_s12  ;;  %s749_s29 = sshll.u32 %s841_s8, 4  ;;  %s750_s29 = int_to_ptr.vmem [resolvable:$false] %s749_s29 }
  0x80   : > { %s751_s13 = scalar_lea.vmem %s750_s29, 512  ;;  %p752_p12 = scmp.lt.s32.totalorder %s1053_s6, %s750_s29 }
  0x81   : > { %p747_p5 = pnand %p745_p3, %p731_p9  ;;  %p753_p1 = scmp.lt.s32.totalorder %s751_s13, %s744_s12 }
  0x83   : > { %p748_p7 = pneg %p747_p5  ;;  %p754_p2 = por %p753_p1, %p752_p12 }
  0x85   : > { %p755_p13 = pnand %p754_p2, %p748_p7 }
  0x87   : > { %758 = shalt.err (!%p755_p13)
}
  0x88   : > { %558 = dma.hbm_to_vmem [thread:$0]  (!%p1055_p11), %s1051_s28, 256, %s1053_s6, %s1059_s30, %s838_s23, %s838_s23, %s839_s27  }
  0x89   : > { %p1177_p9 = scmp.ne.s32.totalorder %s1171_s26, 0 }
  0x8a   : > { %s1093_s7 = sand.u32 (!%p1177_p9), 1, %s825_s19   ;;  %p1178_p0 = scmp.ne.s32.totalorder (!%p1177_p9), %s1169_s24, 0 }
  0x8b   : > { %246 = sbr.rel (%p1177_p9) target bundleno = 491 (0x1eb), region = 40  ;;  %s497_s9 = sshll.u32 (!%p1177_p9), %s1093_s7, 4 }
  0x8c   : > { %s249_s15 = scalar_lea.sflag (!%p1177_p9), [#allocation3], %s1093_s7  ;;  %s252_s16 = scalar_lea.vmem (!%p1177_p9), [#allocation2], %s497_s9 }
  0x92   : > { %804 = dma.done.wait (%p1178_p0), %s249_s15, 256  }
  0x93   : > { %806 = vsyncadd (%p1178_p0), %s249_s15, 4294967040  ;;  %p1179_p6 = scmp.eq.s32.totalorder %s896_s22, 0 }
  0x95   : > { %808 = dma.done.wait (%p1179_p6), [#allocation6], 272   ;;  %p1180_p11 = pmov %p1179_p6 }
  0x96   : > { %p1181_p4 = pmov %p1179_p6 }
  0x97   : > { %810 = vsyncadd (%p1180_p11), [#allocation6], 4294967024 }
  0x98   : > { %812 = dma.done.wait (%p1181_p4), [#allocation9], 32   ;;  %p1182_p8 = pmov %p1181_p4 }
  0x99   : > { %v295_v0 = vld [vmem:[%s252_s16] sm:$0xff]  ;;  %v296_v4 = vld [vmem:[%s252_s16 + $0x8] sm:$0xff]  ;;  %s502_s24 = sshll.u32 %s1093_s7, 3  ;;  %s516_s26 = sshll.u32 %s896_s22, 7 }
  0x9a   : > { %814 = vsyncadd (%p1182_p8), [#allocation9], 4294967264  ;;  %v297_v1 = vld [vmem:[#allocation5] sm:$0xff]  ;;  %v503_v2 = vld [vmem:[#allocation7] ss:$0 sm:$0xff]  ;;  %s294_s23 = scalar_lea.vmem [#allocation11], %s502_s24  ;;  %s1114_s17 = scalar_lea.hbm %s1165_s5, %s516_s26 }
  0x9b   : > { %v299_v3 = vadd.f32 %v297_v1, %v295_v0  ;;  %v298_v5 = vld [vmem:[#allocation5 + $0x8] sm:$0xff]  ;;  %v504_v25 = vld [vmem:[#allocation8] ss:$0 sm:$0xff]  ;;  %v505_v29 = vld [vmem:[#allocation10] ss:$0 sm:$0xff]  ;;  %s375_s27 = sshll.u32 %s294_s23, 4  ;;  %s1116_s27 = int_to_ptr.vmem [resolvable:$true] %s375_s27 }
  0x9c   : > { %v300_v6 = vadd.f32 %v298_v5, %v296_v4  ;;  %s362_s30 = scalar_lea.sflag [#allocation4], %s1093_s7  ;;  %s759_s12 = scalar_lea.vmem %s1116_s27, 128 }
  0x9d   : > { %v308_v7 = vadd.f32 %v503_v2, %v299_v3  ;;  %p760_p3 = scmp.ne.s32.totalorder %s1116_s27, %s759_s12  ;;  %s842_s22 = smov [#allocation11]  }
  0x9e   : > { %v309_v8 = vadd.f32 %v503_v2, %v300_v6  ;;  %s763_s8 = sshll.u32 %s842_s22, 4  ;;  %s764_s8 = int_to_ptr.vmem [resolvable:$false] %s763_s8 }
  0x9f   : > { %312 = vadd.xlane.f32.xlu0 %v308_v7  ;;  %p761_p5 = pnand %p760_p3, %p1038_p10  ;;  %s765_s29 = scalar_lea.vmem %s764_s8, 256 }
  0xa0   : > { %p766_p12 = scmp.lt.s32.totalorder %s1116_s27, %s764_s8  ;;  %p767_p1 = scmp.lt.s32.totalorder %s765_s29, %s759_s12 }
  0xa1   : > { %p762_p7 = pneg %p761_p5 }
  0xa2   : > { %p768_p2 = por %p767_p1, %p766_p12 }
  0xa3   : > { %314 = vadd.xlane.f32.xlu0 %v309_v8 }
  0xa4   : > { %p769_p13 = pnand %p768_p2, %p762_p7 }
 0x12c   : > { %v313_v9 = vpop.xlane.xlu0 %312 }
 0x12d   : > { %v317_v10 = vmul.f32 0.0078125, %v313_v9 }
 0x12f   : > { %v319_v11 = vsub.f32 %v308_v7, %v317_v10 }
 0x130   : > { %v315_v12 = vpop.xlane.xlu0 %314 }
 0x131   : > { %v318_v13 = vmul.f32 0.0078125, %v315_v12  ;;  %v321_v14 = vmul.f32 %v319_v11, %v319_v11 }
 0x133   : > { %v320_v15 = vsub.f32 %v309_v8, %v318_v13  ;;  %323 = vadd.xlane.f32.xlu1 %v321_v14 }
 0x135   : > { %v322_v16 = vmul.f32 %v320_v15, %v320_v15 }
 0x137   : > { %325 = vadd.xlane.f32.xlu1 %v322_v16 }
 0x1c0   : > { %v324_v17 = vpop.xlane.xlu1 %323 }
 0x1c1   : > { %v327_v18 = vmul.f32 0.0078125, %v324_v17 }
 0x1c3   : > { %v329_v19 = vadd.f32 1e-12, %v327_v18 }
 0x1c4   : > { %v326_v20 = vpop.xlane.xlu1 %325 }
 0x1c5   : > { %613 = vrsqrt.f32 %v329_v19  ;;  %v328_v21 = vmul.f32 0.0078125, %v326_v20 }
 0x1c7   : > { %v330_v22 = vadd.f32 1e-12, %v328_v21 }
 0x1c9   : > { %615 = vrsqrt.f32 %v330_v22 }
 0x1cf   : > { %v614_v23 = vpop.eup %613 }
 0x1d0   : > { %v333_v24 = vmul.f32 %v614_v23, %v319_v11 }
 0x1d2   : > { %v341_v27 = vmul.f32 %v504_v25, %v333_v24 }
 0x1d3   : > { %v616_v26 = vpop.eup %615 }
 0x1d4   : > { %v334_v28 = vmul.f32 %v616_v26, %v320_v15  ;;  %v349_v31 = vadd.f32 %v505_v29, %v341_v27 }
 0x1d6   : > { %v342_v30 = vmul.f32 %v504_v25, %v334_v28 }
 0x1d8   : > { %v350_v32 = vadd.f32 %v505_v29, %v342_v30 }
 0x1da   : > { %v520_v33 = vpack.c.bf16 %v350_v32, %v349_v31 }
 0x1dc   : > { %521 = vst [vmem:[%s294_s23] sm:$0xff] %v520_v33  }
 0x1dd   : > { %772 = shalt.err (!%p769_p13)
}
 0x1de   : > { %s773_s13 = scalar_lea.hbm %s1114_s17, 128  ;;  %s777_s16 = scalar_lea.hbm %s1165_s5, 256 }
 0x1df   : > { %p774_p9 = scmp.ne.s32.totalorder %s1114_s17, %s773_s13  ;;  %p778_p11 = scmp.lt.u32.totalorder %s1114_s17, %s1165_s5 }
 0x1e0   : > { %p779_p4 = scmp.lt.u32.totalorder %s777_s16, %s773_s13  ;;  %p781_p3 = scmp.lt.u32.totalorder %s773_s13, %s1114_s17 }
 0x1e1   : > { %p775_p0 = pnand %p774_p9, %p1038_p10 }
 0x1e2   : > { %p780_p8 = por %p779_p4, %p778_p11 }
 0x1e3   : > { %p776_p6 = pneg %p775_p0 }
 0x1e4   : > { %p782_p5 = por %p781_p3, %p780_p8 }
 0x1e6   : > { %p783_p7 = pnand %p782_p5, %p776_p6 }
 0x1e8   : > { %786 = shalt.err (!%p783_p7)
}
 0x1e9   : > { %s843_s23 = smov 64   ;;  %s844_s28 = smov 4  }
 0x1ea   : > { %540 = dma.vmem_to_hbm [thread:$0]  (%p1038_p10), %s1116_s27, 128, %s1114_s17, %s362_s30, %s843_s23, %s843_s23, %s844_s28  }
 0x1eb PF: > { %s390_s6 = sand.u32 1, %s821_s18   ;;  %p1183_p12 = scmp.ne.s32.totalorder %s1170_s25, 0 }
 0x1ec   : > { %p1184_p1 = scmp.ge.s32.totalorder %s833_s21, 2  ;;  %s391_s12 = scalar_lea.sflag [#allocation4], %s390_s6 }
 0x1ee   : > { %p560_p2 = pnand %p1184_p1, %p1183_p12 }
 0x1f0   : > { %816 = dma.done.wait (!%p560_p2), %s391_s12, 128  }
 0x1f1   : > { %818 = vsyncadd (!%p560_p2), %s391_s12, 4294967168  ;;  %p20_p13 = scmp.ge.s32.totalorder %s1028_s14, 4   ;;  %s1185_s18 = smov %s825_s19 }
 0x1f2   : > { %s1186_s19 = smov %s829_s20  ;;  %s1187_s20 = smov %s1044_s11 }
 0x1f3   : > { %s1188_s21 = smov %s1028_s14  ;;  %22 = sbr.rel (!%p20_p13) target bundleno = 7 (0x7), region = 101 }
 0x1fa   :  { %396 = vsyncpa [#allocation3], 1 }
 0x1fb   :  { %398 = vsyncpa [#allocation3 + $0x1], 1 }
 0x1fc   :  { %399 = vsyncpa [#allocation6], 1 }
 0x1fd   :  { %400 = vsyncpa [#allocation9], 1 }
 0x1fe   :  { %401 = vsyncpa [#allocation4], 1 }
 0x1ff   :  { %403 = vsyncpa [#allocation4 + $0x1], 1 }

</bundles_post_ra>
